<compile_context>
chip_gen: v6e
topology: v6e:2x2x1
jax: 0.10.0
libtpu: 0.0.40
codegen_flags: <defaults>
</compile_context>

<pallas_src>
import functools
import math

import jax
import jax.numpy as jnp
from jax.experimental import pallas as pl
from jax.experimental.pallas import tpu as pltpu

_LANE = 128
_SUBLANE = 8
_TM_CANDIDATES = (1024, 512, 256, 128, 64, 32, 16, 8)
_TN_CANDIDATES = (1024, 512, 256, 128)


def _round_up(x, m):
    return ((x + m - 1) // m) * m


def _vmem_budget():
    """Generation-aware VMEM planning budget / hard limit."""
    cap = 64 * 1024 * 1024  # conservative default = v7x physical VMEM
    try:
        info = pltpu.get_tpu_info()
        cap = int(getattr(info, "vmem_capacity_bytes", cap)) or cap
    except Exception:
        pass
    return int(0.70 * cap), int(0.85 * cap)


# ------------------------- Pallas kernels -------------------------

def _cqil_resident_kernel(x_ref, w_ref, b_ref, o_ref, *, resid_scale):
    """out = x @ W_sum + b_sum - resid_scale * x  on one (tm, Hp) row tile.

    x_ref : (tm, Hp)  activation row tile
    w_ref : (Hp, Hp)  bf16 pre-summed weights, VMEM-resident across the grid
    b_ref : (1, Hp)   f32 pre-summed bias, VMEM-resident
    o_ref : (tm, Hp)  output tile
    """
    x = x_ref[...]
    acc = jnp.dot(x.astype(jnp.bfloat16), w_ref[...],
                  preferred_element_type=jnp.float32)
    acc = acc + b_ref[...]
    acc = acc - resid_scale * x.astype(jnp.float32)
    o_ref[...] = acc.astype(o_ref.dtype)


def _cqil_ntiled_kernel(x_row_ref, x_col_ref, w_ref, b_ref, o_ref, *, resid_scale):
    """Large-H path: weights streamed as (Hp, tn) column panels.

    x_row_ref : (tm, Hp)  full-width activation row (stays resident across j)
    x_col_ref : (tm, tn)  activation column tile matching the output columns
    w_ref     : (Hp, tn)  bf16 weight panel (double-buffered)
    b_ref     : (1, tn)   f32 bias panel
    o_ref     : (tm, tn)  output tile
    """
    acc = jnp.dot(x_row_ref[...].astype(jnp.bfloat16), w_ref[...],
                  preferred_element_type=jnp.float32)
    acc = acc + b_ref[...]
    acc = acc - resid_scale * x_col_ref[...].astype(jnp.float32)
    o_ref[...] = acc.astype(o_ref.dtype)


# ------------------------- tiling plan -------------------------

def _cap_tm_for_grid(tm, m_cap):
    # Aim for >=4 grid steps (>=2 per v7x TensorCore) when M is large enough,
    # so the x/out DMAs of one step overlap the compute of another.
    if m_cap >= 4 * 128:
        tm = min(tm, max(128, _round_up(-(-m_cap // 4), _SUBLANE)))
    return tm


def _plan_tiles(m, hp, x_itemsize, budget, w_buffers):
    """Returns (tm, tn, resident). resident=True -> whole W_sum stays in VMEM."""
    m_cap = _round_up(max(m, _SUBLANE), _SUBLANE)

    # Path A: whole (Hp, Hp) bf16 W_sum resident across the M grid.
    for tm in _TM_CANDIDATES:
        if tm > m_cap:
            continue
        resident_bytes = (w_buffers * hp * hp * 2            # bf16 W_sum
                          + w_buffers * _SUBLANE * hp * 4)   # f32 bias row (padded)
        tile_bytes = 2 * 2 * tm * hp * x_itemsize            # x + out, double-buffered
        if resident_bytes + tile_bytes <= budget:
            return _cap_tm_for_grid(tm, m_cap), hp, True

    # Path B: N-tiled fallback -- stream weight column panels (double-buffered).
    # Prefer the largest tm (total W HBM traffic is (M/tm) * Hp^2).
    for tm in _TM_CANDIDATES:
        if tm > m_cap:
            continue
        for tn in _TN_CANDIDATES:
            if tn > hp or hp % tn:
                continue
            need = (2 * hp * tn * 2                  # W panel, double-buffered
                    + 2 * _SUBLANE * tn * 4          # bias panel
                    + 2 * tm * hp * x_itemsize       # x full-width row tile
                    + 2 * tm * tn * x_itemsize       # x column tile (residual)
                    + 2 * tm * tn * x_itemsize)      # out tile
            if need <= budget:
                return tm, tn, False
    return _SUBLANE, _LANE, False


# ------------------------- pallas_call wrapper -------------------------

def _run_fused(x2d, w_p, b_p, Hp, resid_scale, budget, limit, single_buffer_w):
    M, H = x2d.shape
    itemsize = x2d.dtype.itemsize
    tm, tn, resident = _plan_tiles(M, Hp, itemsize, budget,
                                   w_buffers=1 if single_buffer_w else 2)
    Mp = _round_up(max(M, tm), tm)

    x_p = x2d
    if (Mp, Hp) != (M, H):
        x_p = jnp.zeros((Mp, Hp), x2d.dtype).at[:M, :H].set(x2d)

    if resident:
        kernel = functools.partial(_cqil_resident_kernel, resid_scale=resid_scale)
        grid = (Mp // tm,)
        # Constant index_map -> double-buffering the weights is pure VMEM waste.
        w_kwargs = {"pipeline_mode": pl.Buffered(1)} if single_buffer_w else {}
        in_specs = [
            pl.BlockSpec((tm, Hp), lambda i: (i, 0)),                # x row tile
            pl.BlockSpec((Hp, Hp), lambda i: (0, 0), **w_kwargs),    # resident W_sum
            pl.BlockSpec((1, Hp), lambda i: (0, 0), **w_kwargs),     # resident b_sum
        ]
        out_specs = pl.BlockSpec((tm, Hp), lambda i: (i, 0))
        semantics = ("parallel",)
        operands = (x_p, w_p, b_p)
        w_reads = 1
    else:
        kernel = functools.partial(_cqil_ntiled_kernel, resid_scale=resid_scale)
        grid = (Mp // tm, Hp // tn)
        in_specs = [
            pl.BlockSpec((tm, Hp), lambda i, j: (i, 0)),   # x row (resident across j)
            pl.BlockSpec((tm, tn), lambda i, j: (i, j)),   # x column tile (residual)
            pl.BlockSpec((Hp, tn), lambda i, j: (0, j)),   # streamed W panel
            pl.BlockSpec((1, tn), lambda i, j: (0, j)),    # bias panel
        ]
        out_specs = pl.BlockSpec((tm, tn), lambda i, j: (i, j))
        semantics = ("parallel", "parallel")
        operands = (x_p, x_p, w_p, b_p)
        w_reads = Mp // tm

    flops = 2 * Mp * Hp * Hp
    bytes_accessed = (Mp * Hp * itemsize * (2 if resident else 3)
                      + w_reads * Hp * Hp * 2 + Hp * 4)

    out = pl.pallas_call(
        kernel,
        out_shape=jax.ShapeDtypeStruct((Mp, Hp), x2d.dtype),
        grid_spec=pltpu.PrefetchScalarGridSpec(
            num_scalar_prefetch=0,
            grid=grid,
            in_specs=in_specs,
            out_specs=out_specs,
        ),
        compiler_params=pltpu.CompilerParams(
            dimension_semantics=semantics,
            vmem_limit_bytes=limit,
        ),
        cost_estimate=pl.CostEstimate(
            flops=flops, transcendentals=0, bytes_accessed=bytes_accessed),
    )(*operands)

    if (Mp, Hp) != (M, H):
        out = out[:M, :H]
    return out


def fused_cqil_forward(x2d, prepared, vmem_budget_bytes=None):
    """out2d = x2d @ W_sum + b_sum - (R - 1) * x2d, in one pallas_call."""
    Hp = prepared["Hp"]
    resid_scale = float(prepared["world_size"] - 1)
    budget, limit = _vmem_budget()
    if vmem_budget_bytes is not None:
        budget = int(vmem_budget_bytes)
    try:
        # Fast path: single-buffer the constant-index resident weight/bias blocks.
        return _run_fused(x2d, prepared["w"], prepared["b"], Hp, resid_scale,
                          budget, limit, single_buffer_w=True)
    except Exception:
        # TODO(synk): pl.Buffered(1) not accepted on this jax build -- re-plan with
        # double-buffered weights (may pick the N-tiled path instead of resident).
        return _run_fused(x2d, prepared["w"], prepared["b"], Hp, resid_scale,
                          budget, limit, single_buffer_w=False)


# ------------------------- module-level wrapper -------------------------

def prepare_sync_out_params(rank_params, world_size=2):
    """Hoisted, call-once parameter prep (NOT per forward).

    Folds the SUM all-reduce into the parameters: W_sum = sum_r W_r (summed in
    f32, cast to bf16 once), b_sum = sum_r b_r, and pads the hidden dim to a
    lane multiple so kernel stores are lane-dense.
    """
    R = world_size
    w_sum = sum(jnp.asarray(w, jnp.float32) for w, _ in rank_params[:R])
    b_sum = sum(jnp.asarray(b, jnp.float32).reshape(-1) for _, b in rank_params[:R])
    H = w_sum.shape[0]
    Hp = _round_up(max(H, _LANE), _LANE)
    if Hp == H:
        w_p = w_sum.astype(jnp.bfloat16)
        b_p = b_sum.reshape(1, H)
    else:
        w_p = jnp.zeros((Hp, Hp), jnp.bfloat16).at[:H, :H].set(w_sum.astype(jnp.bfloat16))
        b_p = jnp.zeros((1, Hp), jnp.float32).at[0, :H].set(b_sum)
    return {"w": w_p, "b": b_p, "H": H, "Hp": Hp, "world_size": R}


def sync_out_wrapper_forward(x, rank_params=None, world_size=2, prepared=None,
                             vmem_budget_bytes=None):
    """Single-device simulation of SyncOutWrapper.forward (all ranks fused).

    x: [B, S, H]; rank_params: per-rank (W_r, b_r) of the synthetic Linear model.
    Returns the (out,) tuple every rank observes after the SUM all-reduce:
        out = sum_r (x @ W_r + b_r) - (world_size - 1) * x.
    """
    if prepared is None:
        prepared = prepare_sync_out_params(rank_params, world_size)
    B, S, H = x.shape
    assert H == prepared["H"]

    # TODO(synk): the bypass_dist isend/irecv block only ships x to peer ranks and the
    # received buffer is never used by this forward; single-device -> no-op here.
    # TODO(synk): on a real multi-chip mesh the dist.all_reduce(SUM) of per-rank
    # residuals would be done in-kernel with pltpu.make_async_remote_copy +
    # pltpu.get_barrier_semaphore (CompilerParams(collective_id=...)), overlapping
    # tile-i RDMA with the tile-(i+1) matmul; here it is folded algebraically into
    # the pre-summed weights.

    out2d = fused_cqil_forward(x.reshape(B * S, H), prepared,
                               vmem_budget_bytes=vmem_budget_bytes)
    return (out2d.reshape(B, S, H),)


# ------------------------- demo -------------------------

if __name__ == "__main__":
    world_size = 2

    def run_case(B, S, H, key, vmem_budget_bytes=None):
        kx, kw0, kw1, kb0, kb1 = jax.random.split(key, 5)
        scale = 1.0 / math.sqrt(H)
        x = jax.random.normal(kx, (B, S, H), dtype=jnp.float32)
        rank_params = [
            (jax.random.normal(kw0, (H, H), dtype=jnp.float32) * scale,
             jax.random.normal(kb0, (1, H), dtype=jnp.float32) * 0.01),
            (jax.random.normal(kw1, (H, H), dtype=jnp.float32) * scale,
             jax.random.normal(kb1, (1, H), dtype=jnp.float32) * 0.01),
        ]
        prepared = prepare_sync_out_params(rank_params, world_size)  # hoisted, once

        (out,) = sync_out_wrapper_forward(x, prepared=prepared, world_size=world_size,
                                          vmem_budget_bytes=vmem_budget_bytes)
        out = jax.block_until_ready(out)
        assert out.shape == (B, S, H)

        # Reference matched to the kernel numerics: f32 weight sum -> single bf16
        # cast, bf16 MXU operands with f32 accumulation, exact f32 residual.
        x2 = x.reshape(B * S, H)
        w_sum = sum(w for w, _ in rank_params).astype(jnp.bfloat16)
        b_sum = sum(b.reshape(-1) for _, b in rank_params)
        acc = jnp.dot(x2.astype(jnp.bfloat16), w_sum, preferred_element_type=jnp.float32)
        ref_match = (acc + b_sum - (world_size - 1) * x2).reshape(B, S, H)
        assert jnp.allclose(out, ref_match, atol=1e-3, rtol=1e-3), "bf16-matched ref mismatch"

        # Full-f32 PyTorch-style reference (looser: bf16 MXU operand rounding).
        ref_f32 = sum((x @ w_r + b_r.reshape(1, 1, H)) - x
                      for (w_r, b_r) in rank_params) + x
        assert jnp.allclose(out, ref_f32, atol=3e-2, rtol=3e-2), "f32 ref mismatch"

    key = jax.random.PRNGKey(0)
    k1, k2, k3 = jax.random.split(key, 3)
    run_case(2, 8, 32, k1)        # tiny spec shape: resident path, single row tile
    run_case(2, 500, 32, k2)      # multi-tile: tm capped -> grid (4,), padded rows
    run_case(2, 64, 1024, k3, vmem_budget_bytes=2 << 20)  # forces the N-tiled large-H path
    print("KERNEL_OK")
</pallas_src>

<mosaic_0001>
module attributes {stable_mosaic.version = 11 : i64} {
  func.func @_cqil_resident_kernel(%arg0: i32, %arg1: memref<16x128xf32, #tpu.memory_space<vmem>>, %arg2: memref<128x128xbf16, #tpu.memory_space<vmem>>, %arg3: memref<1x128xf32, #tpu.memory_space<vmem>>, %arg4: memref<16x128xf32, #tpu.memory_space<vmem>>) attributes {dimension_semantics = [#tpu.dimension_semantics<parallel>], iteration_bounds = array<i64: 1>, scalar_prefetch = 0 : i64, scratch_operands = 0 : i64, tpu.core_type = #tpu.core_type<tc>, window_params = [{transform_indices = @transform_0, window_bounds = array<i64: 16, 128>}, {pipeline_mode = #tpu.pipeline_mode<synchronous>, transform_indices = @transform_1, window_bounds = array<i64: 128, 128>}, {pipeline_mode = #tpu.pipeline_mode<synchronous>, transform_indices = @transform_2, window_bounds = array<i64: 1, 128>}, {transform_indices = @transform_3, window_bounds = array<i64: 16, 128>}]} {
    %c0 = arith.constant 0 : index
    %c0_0 = arith.constant 0 : index
    %0 = vector.load %arg1[%c0, %c0_0] : memref<16x128xf32, #tpu.memory_space<vmem>>, vector<16x128xf32>
    %1 = arith.truncf %0 : vector<16x128xf32> to vector<16x128xbf16>
    %c0_1 = arith.constant 0 : index
    %c0_2 = arith.constant 0 : index
    %2 = vector.load %arg2[%c0_1, %c0_2] : memref<128x128xbf16, #tpu.memory_space<vmem>>, vector<128x128xbf16>
    %cst = arith.constant dense<0.000000e+00> : vector<16x128xf32>
    %3 = tpu.matmul %1, %2, %cst {dimension_numbers = #tpu.dot_dimension_numbers<[1], [0], [0], [1], [0, 0, 1, 1], [], []>} : vector<16x128xbf16>, vector<128x128xbf16>, vector<16x128xf32> -> vector<16x128xf32>
    %c0_3 = arith.constant 0 : index
    %c0_4 = arith.constant 0 : index
    %4 = vector.load %arg3[%c0_3, %c0_4] : memref<1x128xf32, #tpu.memory_space<vmem>>, vector<1x128xf32>
    %5 = vector.broadcast %4 : vector<1x128xf32> to vector<16x128xf32>
    %6 = arith.addf %3, %5 : vector<16x128xf32>
    %cst_5 = arith.constant 1.000000e+00 : f32
    %7 = vector.broadcast %cst_5 : f32 to vector<16x128xf32>
    %8 = arith.mulf %7, %0 : vector<16x128xf32>
    %9 = arith.subf %6, %8 : vector<16x128xf32>
    %c0_6 = arith.constant 0 : index
    %c0_7 = arith.constant 0 : index
    %10 = vector.load %arg4[%c0_6, %c0_7] : memref<16x128xf32, #tpu.memory_space<vmem>>, vector<16x128xf32>
    tpu.vector_store %arg4[%c0_6, %c0_7], %9 {strides = array<i32>} : memref<16x128xf32, #tpu.memory_space<vmem>>, vector<16x128xf32>,
    return
  }
  func.func @transform_0(%arg0: i32) -> (i32, i32) {
    %c0_i32 = arith.constant 0 : i32
    %c0_i32_0 = arith.constant 0 : i32
    return %arg0, %c0_i32 : i32, i32
  }
  func.func @transform_1(%arg0: i32) -> (i32, i32) {
    %c0_i32 = arith.constant 0 : i32
    %c0_i32_0 = arith.constant 0 : i32
    %c0_i32_1 = arith.constant 0 : i32
    return %c0_i32, %c0_i32_0 : i32, i32
  }
  func.func @transform_2(%arg0: i32) -> (i32, i32) {
    %c0_i32 = arith.constant 0 : i32
    %c0_i32_0 = arith.constant 0 : i32
    %c0_i32_1 = arith.constant 0 : i32
    return %c0_i32, %c0_i32_0 : i32, i32
  }
  func.func @transform_3(%arg0: i32) -> (i32, i32) {
    %c0_i32 = arith.constant 0 : i32
    %c0_i32_0 = arith.constant 0 : i32
    return %arg0, %c0_i32 : i32, i32
  }
}

module attributes {stable_mosaic.version = 11 : i64} {
  func.func @_cqil_resident_kernel(%arg0: i32, %arg1: memref<16x128xf32, #tpu.memory_space<vmem>>, %arg2: memref<128x128xbf16, #tpu.memory_space<vmem>>, %arg3: memref<1x128xf32, #tpu.memory_space<vmem>>, %arg4: memref<16x128xf32, #tpu.memory_space<vmem>>) attributes {dimension_semantics = [#tpu.dimension_semantics<parallel>], iteration_bounds = array<i64: 1>, scalar_prefetch = 0 : i64, scratch_operands = 0 : i64, tpu.core_type = #tpu.core_type<tc>, window_params = [{transform_indices = @transform_0, window_bounds = array<i64: 16, 128>}, {pipeline_mode = #tpu.pipeline_mode<synchronous>, transform_indices = @transform_1, window_bounds = array<i64: 128, 128>}, {pipeline_mode = #tpu.pipeline_mode<synchronous>, transform_indices = @transform_2, window_bounds = array<i64: 1, 128>}, {transform_indices = @transform_3, window_bounds = array<i64: 16, 128>}]} {
    %c0 = arith.constant 0 : index
    %c0_0 = arith.constant 0 : index
    %0 = vector.load %arg1[%c0, %c0_0] : memref<16x128xf32, #tpu.memory_space<vmem>>, vector<16x128xf32>
    %1 = arith.truncf %0 : vector<16x128xf32> to vector<16x128xbf16>
    %c0_1 = arith.constant 0 : index
    %c0_2 = arith.constant 0 : index
    %2 = vector.load %arg2[%c0_1, %c0_2] : memref<128x128xbf16, #tpu.memory_space<vmem>>, vector<128x128xbf16>
    %cst = arith.constant dense<0.000000e+00> : vector<16x128xf32>
    %3 = tpu.matmul %1, %2, %cst {dimension_numbers = #tpu.dot_dimension_numbers<[1], [0], [0], [1], [0, 0, 1, 1], [], []>} : vector<16x128xbf16>, vector<128x128xbf16>, vector<16x128xf32> -> vector<16x128xf32>
    %c0_3 = arith.constant 0 : index
    %c0_4 = arith.constant 0 : index
    %4 = vector.load %arg3[%c0_3, %c0_4] : memref<1x128xf32, #tpu.memory_space<vmem>>, vector<1x128xf32>
    %5 = vector.broadcast %4 : vector<1x128xf32> to vector<16x128xf32>
    %6 = arith.addf %3, %5 : vector<16x128xf32>
    %cst_5 = arith.constant 1.000000e+00 : f32
    %7 = vector.broadcast %cst_5 : f32 to vector<16x128xf32>
    %8 = arith.mulf %7, %0 : vector<16x128xf32>
    %9 = arith.subf %6, %8 : vector<16x128xf32>
    %c0_6 = arith.constant 0 : index
    %c0_7 = arith.constant 0 : index
    %10 = vector.load %arg4[%c0_6, %c0_7] : memref<16x128xf32, #tpu.memory_space<vmem>>, vector<16x128xf32>
    tpu.vector_store %arg4[%c0_6, %c0_7], %9 {strides = array<i32>} : memref<16x128xf32, #tpu.memory_space<vmem>>, vector<16x128xf32>,
    return
  }
  func.func @transform_0(%arg0: i32) -> (i32, i32) {
    %c0_i32 = arith.constant 0 : i32
    %c0_i32_0 = arith.constant 0 : i32
    return %arg0, %c0_i32 : i32, i32
  }
  func.func @transform_1(%arg0: i32) -> (i32, i32) {
    %c0_i32 = arith.constant 0 : i32
    %c0_i32_0 = arith.constant 0 : i32
    %c0_i32_1 = arith.constant 0 : i32
    return %c0_i32, %c0_i32_0 : i32, i32
  }
  func.func @transform_2(%arg0: i32) -> (i32, i32) {
    %c0_i32 = arith.constant 0 : i32
    %c0_i32_0 = arith.constant 0 : i32
    %c0_i32_1 = arith.constant 0 : i32
    return %c0_i32, %c0_i32_0 : i32, i32
  }
  func.func @transform_3(%arg0: i32) -> (i32, i32) {
    %c0_i32 = arith.constant 0 : i32
    %c0_i32_0 = arith.constant 0 : i32
    return %arg0, %c0_i32 : i32, i32
  }
}

</mosaic_0001>

<bundles_post_ra>
// kernel: tpu_custom_call.1
= control target key start
LH: loop header
LB: loop body
LE: loop exit
PB: predicated region body
PF: predicated region fallthrough
CT: control target
= control target key end

     0   :  { %8 = vsyncpa [#allocation3], 0  ;;  %s349_s0 = inlined_call_operand.hbm [shape: f32[16,128], index: 0, kind: input, shape index: {}]   ;;  %s350_s1 = inlined_call_operand.hbm [shape: bf16[128,128], index: 1, kind: input, shape index: {}]   ;;  %s351_s2 = inlined_call_operand.vmem [shape: f32[1,128], index: 2, kind: input, shape index: {}]   ;;  %s352_s3 = inlined_call_operand.hbm [shape: f32[16,128], index: 3, kind: output, shape index: {}]  }
   0x1   :  { %9 = vsyncpa [#allocation6], 0 }
   0x2   :  { %10 = vsyncpa [#allocation4], 0  ;;  %s302_s12 = smov [#allocation2]  }
   0x3   :  { %s16_s13 = sshll.u32 %s302_s12, 4  ;;  %s17_s13 = int_to_ptr.vmem [resolvable:$true] %s16_s13 }
   0x4   :  { %s244_s14 = scalar_lea.vmem %s17_s13, 256  ;;  %p249_p1 = scmp.lt.s32.totalorder %s17_s13, %s17_s13 }
   0x5   :  { %p245_p0 = scmp.ne.s32.totalorder %s17_s13, %s244_s14  ;;  %p250_p2 = scmp.lt.s32.totalorder %s244_s14, %s244_s14 }
   0x7   :  { %p251_p3 = por %p250_p2, %p249_p1 }
   0x9   :  { %p252_p4 = pnand %p251_p3, %p245_p0 }
   0xb   :  { %255 = shalt.err (!%p252_p4)
}
   0xc   :  { %s303_s15 = smov 128   ;;  %s304_s16 = smov 8  }
   0xd   :  { %22 = dma.hbm_to_vmem [thread:$0]  %s349_s0, 256, %s17_s13, [#allocation3], %s303_s15, %s303_s15, %s304_s16  }
   0xe   :  { %s305_s19 = smov [#allocation5]  }
   0xf   :  { %s28_s20 = sshll.u32 %s305_s19, 4  ;;  %s29_s20 = int_to_ptr.vmem [resolvable:$true] %s28_s20 }
  0x10   :  { %s264_s21 = scalar_lea.vmem %s29_s20, 1024  ;;  %p269_p6 = scmp.lt.s32.totalorder %s29_s20, %s29_s20 }
  0x11   :  { %p265_p5 = scmp.ne.s32.totalorder %s29_s20, %s264_s21  ;;  %p270_p7 = scmp.lt.s32.totalorder %s264_s21, %s264_s21 }
  0x13   :  { %p271_p8 = por %p270_p7, %p269_p6 }
  0x15   :  { %p272_p9 = pnand %p271_p8, %p265_p5 }
  0x17   :  { %275 = shalt.err (!%p272_p9)
}
  0x18   :  { %s306_s22 = smov 64   ;;  %s307_s23 = smov 4  }
  0x19   :  { %34 = dma.hbm_to_vmem [thread:$0]  %s350_s1, 1024, %s29_s20, [#allocation6], %s306_s22, %s306_s22, %s307_s23  }
  0x1a   :  { %296 = dma.done.wait [#allocation3], 256  }
  0x1b   :  { %297 = vsyncadd [#allocation3], 4294967040 }
  0x1c   :  { %298 = dma.done.wait [#allocation6], 1024  }
  0x1d   :  { %299 = vsyncadd [#allocation6], 4294966272  ;;  %v308_v0 = vmov 0.0   ;;  %vm309_vm0 = vmmov 0   ;;  %v228_v1 = vld [vmem:[#allocation5 + $0x38] sm:$0xff]   ;;  %v229_v2 = vld [vmem:[#allocation5 + $0x30] sm:$0xff]  }
  0x1e   :  { %199 = vmatprep.subr.bf16.mxu0 %v308_v0  ;;  %215 = vmatprep.mubr.msk.bf16.mxu0 %vm309_vm0, %v308_v0  ;;  %v230_v3 = vld [vmem:[#allocation5 + $0x28] sm:$0xff]   ;;  %v231_v4 = vld [vmem:[#allocation5 + $0x20] sm:$0xff]   ;;  %v232_v5 = vld [vmem:[#allocation5 + $0x18] sm:$0xff]   ;;  %s310_s26 = smov [#allocation7]  }
  0x1f   :  { %200 = vmatpush3.bf16.msra.mxu0 %v228_v1  ;;  %v233_v6 = vld [vmem:[#allocation5 + $0x10] sm:$0xff]   ;;  %v234_v7 = vld [vmem:[#allocation5 + $0x8] sm:$0xff]   ;;  %v235_v8 = vld [vmem:[#allocation5] sm:$0xff]   ;;  %s168_s27 = sshll.u32 %s310_s26, 4  ;;  %s169_s27 = int_to_ptr.vmem [resolvable:$true] %s168_s27 }
  0x20   :  { %201 = vmatprep.subr.bf16.mxu0 %v308_v0  ;;  %v44_v9 = vld [vmem:[#allocation2] sm:$0xff]  ;;  %v45_v10 = vld [vmem:[#allocation2 + $0x8] sm:$0xff]  ;;  %s276_s28 = scalar_lea.vmem %s169_s27, 256  ;;  %p281_p11 = scmp.lt.s32.totalorder %s169_s27, %s169_s27 }
  0x21   :  { %v46_v11 = vpack.c.bf16 %v45_v10, %v44_v9  ;;  %v181_v12 = vld [vmem:[%s351_s2] ss:$0 sm:$0xff]  ;;  %p277_p10 = scmp.ne.s32.totalorder %s169_s27, %s276_s28  ;;  %p282_p12 = scmp.lt.s32.totalorder %s276_s28, %s276_s28 }
  0x23   :  { %202 = vmatpush3.bf16.msra.mxu0 %v229_v2  ;;  %p283_p13 = por %p282_p12, %p281_p11 }
  0x24   :  { %203 = vmatprep.subr.bf16.mxu0 %v308_v0 }
  0x25   :  { %p284_p0 = pnand %p283_p13, %p277_p10 }
  0x27   :  { %204 = vmatpush3.bf16.msra.mxu0 %v230_v3 }
  0x28   :  { %205 = vmatprep.subr.bf16.mxu0 %v308_v0 }
  0x2b   :  { %206 = vmatpush3.bf16.msra.mxu0 %v231_v4 }
  0x2c   :  { %207 = vmatprep.subr.bf16.mxu0 %v308_v0 }
  0x2f   :  { %208 = vmatpush3.bf16.msra.mxu0 %v232_v5 }
  0x30   :  { %209 = vmatprep.subr.bf16.mxu0 %v308_v0 }
  0x33   :  { %210 = vmatpush3.bf16.msra.mxu0 %v233_v6 }
  0x34   :  { %211 = vmatprep.subr.bf16.mxu0 %v308_v0 }
  0x37   :  { %212 = vmatpush3.bf16.msra.mxu0 %v234_v7 }
  0x38   :  { %213 = vmatprep.subr.bf16.mxu0 %v308_v0 }
  0x3b   :  { %214 = vmatpush3.bf16.msra.mxu0 %v235_v8 }
  0x3e   :  { %216 = vmatmul.mubr.bf16.vlgmr.msra.gmra.mxu0 %v46_v11 }
  0xfe   :  { %v152_v13 = vpop.f32.mrf.mxu0 }
  0xff   :  { %v153_v14 = vadd.f32 %v181_v12, %v152_v13 }
 0x100   :  { %v217_v15 = vpop.f32.mrf.mxu0 }
 0x101   :  { %v159_v16 = vsub.f32 %v153_v14, %v44_v9 }
 0x102   :  { %v155_v17 = vpop.f32.mrf.mxu0 }
 0x103   :  { %161 = vst [vmem:[#allocation7] sm:$0xff] %v159_v16  ;;  %v156_v18 = vadd.f32 %v181_v12, %v155_v17 }
 0x104   :  { %v218_v19 = vpop.f32.mrf.mxu0 }
 0x105   :  { %v160_v20 = vsub.f32 %v156_v18, %v45_v10 }
 0x107   :  { %162 = vst [vmem:[#allocation7 + $0x8] sm:$0xff] %v160_v20 }
 0x108   :  { %287 = shalt.err (!%p284_p0)
}
 0x109   :  { %174 = dma.vmem_to_hbm [thread:$0]  %s169_s27, 256, %s352_s3, [#allocation4], %s303_s15, %s303_s15, %s304_s16  }
 0x10a   :  { %300 = dma.done.wait [#allocation4], 256  }
 0x10b   :  { %301 = vsyncadd [#allocation4], 4294967040 }
 0x10c   :  { %178 = vsyncpa [#allocation3], 1 }
 0x10d   :  { %179 = vsyncpa [#allocation6], 1 }
 0x10e   :  { %180 = vsyncpa [#allocation4], 1 }

// kernel: tpu_custom_call.1
= control target key start
LH: loop header
LB: loop body
LE: loop exit
PB: predicated region body
PF: predicated region fallthrough
CT: control target
= control target key end

     0   :  { %8 = vsyncpa [#allocation3], 0  ;;  %s349_s0 = inlined_call_operand.hbm [shape: f32[16,128], index: 0, kind: input, shape index: {}]   ;;  %s350_s1 = inlined_call_operand.hbm [shape: bf16[128,128], index: 1, kind: input, shape index: {}]   ;;  %s351_s2 = inlined_call_operand.vmem [shape: f32[1,128], index: 2, kind: input, shape index: {}]   ;;  %s352_s3 = inlined_call_operand.hbm [shape: f32[16,128], index: 3, kind: output, shape index: {}]  }
   0x1   :  { %9 = vsyncpa [#allocation6], 0 }
   0x2   :  { %10 = vsyncpa [#allocation4], 0  ;;  %s302_s12 = smov [#allocation2]  }
   0x3   :  { %s16_s13 = sshll.u32 %s302_s12, 4  ;;  %s17_s13 = int_to_ptr.vmem [resolvable:$true] %s16_s13 }
   0x4   :  { %s244_s14 = scalar_lea.vmem %s17_s13, 256  ;;  %p249_p1 = scmp.lt.s32.totalorder %s17_s13, %s17_s13 }
   0x5   :  { %p245_p0 = scmp.ne.s32.totalorder %s17_s13, %s244_s14  ;;  %p250_p2 = scmp.lt.s32.totalorder %s244_s14, %s244_s14 }
   0x7   :  { %p251_p3 = por %p250_p2, %p249_p1 }
   0x9   :  { %p252_p4 = pnand %p251_p3, %p245_p0 }
   0xb   :  { %255 = shalt.err (!%p252_p4)
}
   0xc   :  { %s303_s15 = smov 128   ;;  %s304_s16 = smov 8  }
   0xd   :  { %22 = dma.hbm_to_vmem [thread:$0]  %s349_s0, 256, %s17_s13, [#allocation3], %s303_s15, %s303_s15, %s304_s16  }
   0xe   :  { %s305_s19 = smov [#allocation5]  }
   0xf   :  { %s28_s20 = sshll.u32 %s305_s19, 4  ;;  %s29_s20 = int_to_ptr.vmem [resolvable:$true] %s28_s20 }
  0x10   :  { %s264_s21 = scalar_lea.vmem %s29_s20, 1024  ;;  %p269_p6 = scmp.lt.s32.totalorder %s29_s20, %s29_s20 }
  0x11   :  { %p265_p5 = scmp.ne.s32.totalorder %s29_s20, %s264_s21  ;;  %p270_p7 = scmp.lt.s32.totalorder %s264_s21, %s264_s21 }
  0x13   :  { %p271_p8 = por %p270_p7, %p269_p6 }
  0x15   :  { %p272_p9 = pnand %p271_p8, %p265_p5 }
  0x17   :  { %275 = shalt.err (!%p272_p9)
}
  0x18   :  { %s306_s22 = smov 64   ;;  %s307_s23 = smov 4  }
  0x19   :  { %34 = dma.hbm_to_vmem [thread:$0]  %s350_s1, 1024, %s29_s20, [#allocation6], %s306_s22, %s306_s22, %s307_s23  }
  0x1a   :  { %296 = dma.done.wait [#allocation3], 256  }
  0x1b   :  { %297 = vsyncadd [#allocation3], 4294967040 }
  0x1c   :  { %298 = dma.done.wait [#allocation6], 1024  }
  0x1d   :  { %299 = vsyncadd [#allocation6], 4294966272  ;;  %v308_v0 = vmov 0.0   ;;  %vm309_vm0 = vmmov 0   ;;  %v228_v1 = vld [vmem:[#allocation5 + $0x38] sm:$0xff]   ;;  %v229_v2 = vld [vmem:[#allocation5 + $0x30] sm:$0xff]  }
  0x1e   :  { %199 = vmatprep.subr.bf16.mxu0 %v308_v0  ;;  %215 = vmatprep.mubr.msk.bf16.mxu0 %vm309_vm0, %v308_v0  ;;  %v230_v3 = vld [vmem:[#allocation5 + $0x28] sm:$0xff]   ;;  %v231_v4 = vld [vmem:[#allocation5 + $0x20] sm:$0xff]   ;;  %v232_v5 = vld [vmem:[#allocation5 + $0x18] sm:$0xff]   ;;  %s310_s26 = smov [#allocation7]  }
  0x1f   :  { %200 = vmatpush3.bf16.msra.mxu0 %v228_v1  ;;  %v233_v6 = vld [vmem:[#allocation5 + $0x10] sm:$0xff]   ;;  %v234_v7 = vld [vmem:[#allocation5 + $0x8] sm:$0xff]   ;;  %v235_v8 = vld [vmem:[#allocation5] sm:$0xff]   ;;  %s168_s27 = sshll.u32 %s310_s26, 4  ;;  %s169_s27 = int_to_ptr.vmem [resolvable:$true] %s168_s27 }
  0x20   :  { %201 = vmatprep.subr.bf16.mxu0 %v308_v0  ;;  %v44_v9 = vld [vmem:[#allocation2] sm:$0xff]  ;;  %v45_v10 = vld [vmem:[#allocation2 + $0x8] sm:$0xff]  ;;  %s276_s28 = scalar_lea.vmem %s169_s27, 256  ;;  %p281_p11 = scmp.lt.s32.totalorder %s169_s27, %s169_s27 }
  0x21   :  { %v46_v11 = vpack.c.bf16 %v45_v10, %v44_v9  ;;  %v181_v12 = vld [vmem:[%s351_s2] ss:$0 sm:$0xff]  ;;  %p277_p10 = scmp.ne.s32.totalorder %s169_s27, %s276_s28  ;;  %p282_p12 = scmp.lt.s32.totalorder %s276_s28, %s276_s28 }
  0x23   :  { %202 = vmatpush3.bf16.msra.mxu0 %v229_v2  ;;  %p283_p13 = por %p282_p12, %p281_p11 }
  0x24   :  { %203 = vmatprep.subr.bf16.mxu0 %v308_v0 }
  0x25   :  { %p284_p0 = pnand %p283_p13, %p277_p10 }
  0x27   :  { %204 = vmatpush3.bf16.msra.mxu0 %v230_v3 }
  0x28   :  { %205 = vmatprep.subr.bf16.mxu0 %v308_v0 }
  0x2b   :  { %206 = vmatpush3.bf16.msra.mxu0 %v231_v4 }
  0x2c   :  { %207 = vmatprep.subr.bf16.mxu0 %v308_v0 }
  0x2f   :  { %208 = vmatpush3.bf16.msra.mxu0 %v232_v5 }
  0x30   :  { %209 = vmatprep.subr.bf16.mxu0 %v308_v0 }
  0x33   :  { %210 = vmatpush3.bf16.msra.mxu0 %v233_v6 }
  0x34   :  { %211 = vmatprep.subr.bf16.mxu0 %v308_v0 }
  0x37   :  { %212 = vmatpush3.bf16.msra.mxu0 %v234_v7 }
  0x38   :  { %213 = vmatprep.subr.bf16.mxu0 %v308_v0 }
  0x3b   :  { %214 = vmatpush3.bf16.msra.mxu0 %v235_v8 }
  0x3e   :  { %216 = vmatmul.mubr.bf16.vlgmr.msra.gmra.mxu0 %v46_v11 }
  0xfe   :  { %v152_v13 = vpop.f32.mrf.mxu0 }
  0xff   :  { %v153_v14 = vadd.f32 %v181_v12, %v152_v13 }
 0x100   :  { %v217_v15 = vpop.f32.mrf.mxu0 }
 0x101   :  { %v159_v16 = vsub.f32 %v153_v14, %v44_v9 }
 0x102   :  { %v155_v17 = vpop.f32.mrf.mxu0 }
 0x103   :  { %161 = vst [vmem:[#allocation7] sm:$0xff] %v159_v16  ;;  %v156_v18 = vadd.f32 %v181_v12, %v155_v17 }
 0x104   :  { %v218_v19 = vpop.f32.mrf.mxu0 }
 0x105   :  { %v160_v20 = vsub.f32 %v156_v18, %v45_v10 }
 0x107   :  { %162 = vst [vmem:[#allocation7 + $0x8] sm:$0xff] %v160_v20 }
 0x108   :  { %287 = shalt.err (!%p284_p0)
}
 0x109   :  { %174 = dma.vmem_to_hbm [thread:$0]  %s169_s27, 256, %s352_s3, [#allocation4], %s303_s15, %s303_s15, %s304_s16  }
 0x10a   :  { %300 = dma.done.wait [#allocation4], 256  }
 0x10b   :  { %301 = vsyncadd [#allocation4], 4294967040 }
 0x10c   :  { %178 = vsyncpa [#allocation3], 1 }
 0x10d   :  { %179 = vsyncpa [#allocation6], 1 }
 0x10e   :  { %180 = vsyncpa [#allocation4], 1 }

</bundles_post_ra>
